<compile_context>
chip_gen: v5e
topology: v5e:2x2
jax: 0.10.0
libtpu: 0.0.40
codegen_flags: <defaults>
</compile_context>

<pallas_src>
import functools

import jax
import jax.numpy as jnp
from jax import lax
from jax.experimental import pallas as pl
from jax.experimental.pallas import tpu as pltpu


# --------------------------------------------------------------------------- #
# Kernel
# --------------------------------------------------------------------------- #
def _linear_kernel(*refs, has_bias, use_acc, weight_kn, k_rem, tk):
    if has_bias:
        x_ref, w_ref, b_ref, o_ref = refs[:4]
        acc_ref = refs[4] if use_acc else o_ref
    else:
        x_ref, w_ref, o_ref = refs[:3]
        b_ref = None
        acc_ref = refs[3] if use_acc else o_ref

    k = pl.program_id(2)
    nk = pl.num_programs(2)

    @pl.when(k == 0)
    def _():
        acc_ref[...] = jnp.zeros_like(acc_ref)

    x = x_ref[...]
    if k_rem:  # static: K % tk != 0 -> zero the garbage K-tail columns of x.
        valid = jnp.where(k == nk - 1, k_rem, tk)
        col = lax.broadcasted_iota(jnp.int32, x.shape, 1)
        x = jnp.where(col < valid, x, jnp.zeros_like(x))

    if weight_kn:
        dims = (((1,), (0,)), ((), ()))   # x:(tm,tk) @ w:(tk,tn)
    else:
        dims = (((1,), (1,)), ((), ()))   # x:(tm,tk) @ w:(tn,tk)  (contract K,K)
    acc_ref[...] += lax.dot_general(
        x, w_ref[...], dimension_numbers=dims,
        preferred_element_type=jnp.float32)

    if has_bias or use_acc:
        @pl.when(k == nk - 1)
        def _():
            acc = acc_ref[...]
            if has_bias:
                acc = acc + b_ref[...].astype(jnp.float32)
            o_ref[...] = acc.astype(o_ref.dtype)


# --------------------------------------------------------------------------- #
# Tile planning
# --------------------------------------------------------------------------- #
def _round_up(x, m):
    return ((x + m - 1) // m) * m


def _largest_tile(dim, target, mult):
    """Full dim if it already fits under target, else the largest multiple of
    `mult` <= target (partial trailing blocks are masked by Pallas / in-kernel)."""
    if dim <= target:
        return dim
    return max(mult, (target // mult) * mult)


def _vmem_budget_bytes():
    phys = 64 * 1024 * 1024          # conservative fallback if the query fails
    try:
        phys = int(pltpu.get_tpu_info().vmem_capacity_bytes)
    except Exception:
        pass
    # Leave ~25% headroom for Mosaic-internal scratch / double-buffering:
    # ~96 MiB on v5e/v6e (128 MiB physical), ~48 MiB on v7x (64 MiB physical).
    return (phys * 3) // 4


def _vmem_bytes(tm, tn, tk, x_item, w_item, out_item, use_acc):
    b = 2 * tm * tk * x_item        # x tile, double-buffered
    b += 2 * tn * tk * w_item       # weight tile, double-buffered
    b += 2 * tm * tn * out_item     # output tile, double-buffered
    if use_acc:
        b += tm * tn * 4            # f32 accumulator scratch
    b += 2 * 128 * 4                # bias row (negligible)
    return b


def _plan_tiles(M, N, K, x_item, w_item, out_item, use_acc, budget):
    tm = _largest_tile(M, 512, 8)

    # Full-weight-resident plan: constant weight block index across the grid
    # -> the weight is DMA'd from HBM exactly once.  Wins for small-M calls.
    if _vmem_bytes(tm, N, K, x_item, w_item, out_item, use_acc) <= budget:
        return tm, N, K

    tn = _largest_tile(N, 512, 128)
    tk_target = 1024 if x_item >= 4 else 2048
    tk = _largest_tile(K, tk_target, 128)

    def shrink(v, mult, floor):
        nv = max(floor, _round_up(v // 2, mult))
        return nv if nv < v else v

    # Rarely triggers: the caps above are ~13-26 MiB.
    while _vmem_bytes(tm, tn, tk, x_item, w_item, out_item, use_acc) > budget:
        tk2 = shrink(tk, 128, 256)
        if tk2 < tk:
            tk = tk2
            continue
        tn2 = shrink(tn, 128, 256)
        if tn2 < tn:
            tn = tn2
            continue
        tm2 = shrink(tm, 8, 128)
        if tm2 < tm:
            tm = tm2
            continue
        break
    return tm, tn, tk


# --------------------------------------------------------------------------- #
# Wrapper
# --------------------------------------------------------------------------- #
def prepare_weight(weight):
    """One-time (parameter-load-time) transpose to (in_features, out_features).
    Pass the result with weight_layout="kn" to use the plain ((1,),(0,)) MXU
    contraction and rule out any per-K-step RHS transpose in the lowering."""
    return jnp.asarray(weight).T


def sparse_method_linear_output_forward(
        x, weight, bias=None, *, weight_layout="nk", compute_dtype=None):
    """Computes x @ weight.T + bias (the module's forward) with a Pallas kernel.

    x:      (..., in_features)
    weight: (out_features, in_features) if weight_layout == "nk" (nn.Linear
            convention), or (in_features, out_features) if "kn"
            (see prepare_weight()).
    bias:   (out_features,) or None.
    compute_dtype: optionally cast x/weight (e.g. jnp.bfloat16) for the MXU;
            accumulation stays f32 and the output keeps x.dtype.  Default off
            so numerics match the f32 PyTorch reference.
    """
    assert weight_layout in ("nk", "kn")
    weight_kn = weight_layout == "kn"

    orig_shape = x.shape
    out_dtype = x.dtype
    K = orig_shape[-1]
    if weight_kn:
        K_w, N = weight.shape
    else:
        N, K_w = weight.shape
    assert K == K_w, f"in_features mismatch: {K} vs {K_w}"

    M = x.size // K
    x2 = x.reshape(M, K)
    w2 = weight
    b2 = None if bias is None else bias.reshape(1, N)

    if compute_dtype is not None:
        x2 = x2.astype(compute_dtype)
        w2 = w2.astype(compute_dtype)

    # Lane-dense output path for narrow heads: pad N up to a full 128-lane
    # store and slice afterwards (weight/bias are tiny in this regime).
    N_orig = N
    if N < 128:
        pad = 128 - N
        w2 = jnp.pad(w2, ((0, 0), (0, pad)) if weight_kn else ((0, pad), (0, 0)))
        if b2 is not None:
            b2 = jnp.pad(b2, ((0, 0), (0, pad)))
        N = 128

    x_item = jnp.dtype(x2.dtype).itemsize
    w_item = jnp.dtype(w2.dtype).itemsize
    out_item = jnp.dtype(out_dtype).itemsize
    use_acc = jnp.dtype(out_dtype) != jnp.dtype(jnp.float32)

    budget = int(_vmem_budget_bytes())
    tm, tn, tk = _plan_tiles(M, N, K, x_item, w_item, out_item, use_acc, budget)

    grid_m, grid_n, grid_k = pl.cdiv(M, tm), pl.cdiv(N, tn), pl.cdiv(K, tk)

    # Give v7x's two TensorCores something to shard over when one tile would
    # cover both parallel axes (harmless on single-TC v5e/v6e).
    if grid_m == 1 and grid_n == 1 and N >= 256:
        tn = max(128, _round_up((N + 1) // 2, 128))
        grid_n = pl.cdiv(N, tn)

    k_rem = K % tk

    x_spec = pl.BlockSpec((tm, tk), lambda i, j, k: (i, k))
    if weight_kn:
        w_spec = pl.BlockSpec((tk, tn), lambda i, j, k: (k, j))
    else:
        w_spec = pl.BlockSpec((tn, tk), lambda i, j, k: (j, k))
    o_spec = pl.BlockSpec((tm, tn), lambda i, j, k: (i, j))

    in_specs = [x_spec, w_spec]
    inputs = [x2, w2]
    if b2 is not None:
        in_specs.append(pl.BlockSpec((1, tn), lambda i, j, k: (0, j)))
        inputs.append(b2)

    scratch_shapes = [pltpu.VMEM((tm, tn), jnp.float32)] if use_acc else []

    bytes_accessed = M * K * x_item + N * K * w_item + M * N * out_item
    if b2 is not None:
        bytes_accessed += N * jnp.dtype(b2.dtype).itemsize
    cost = pl.CostEstimate(flops=2 * M * N * K, transcendentals=0,
                           bytes_accessed=bytes_accessed)

    kernel = functools.partial(
        _linear_kernel, has_bias=b2 is not None, use_acc=use_acc,
        weight_kn=weight_kn, k_rem=k_rem, tk=tk)

    out = pl.pallas_call(
        kernel,
        out_shape=jax.ShapeDtypeStruct((M, N), out_dtype),
        grid_spec=pltpu.PrefetchScalarGridSpec(
            num_scalar_prefetch=0,
            grid=(grid_m, grid_n, grid_k),
            in_specs=in_specs,
            out_specs=o_spec,
            scratch_shapes=scratch_shapes,
        ),
        compiler_params=pltpu.CompilerParams(
            dimension_semantics=("parallel", "parallel", "arbitrary"),
            vmem_limit_bytes=budget,
        ),
        cost_estimate=cost,
    )(*inputs)

    if N != N_orig:
        out = out[:, :N_orig]
    return out.reshape(orig_shape[:-1] + (N_orig,))


# --------------------------------------------------------------------------- #
# Parameter init matching nn.Linear / kaiming_uniform_(a=sqrt(5))
# --------------------------------------------------------------------------- #
def init_params(key, in_features, out_features, dtype=jnp.float32):
    kw, kb = jax.random.split(key)
    bound = 1.0 / (in_features ** 0.5)   # kaiming_uniform(a=sqrt(5)) -> 1/sqrt(fan_in)
    weight = jax.random.uniform(kw, (out_features, in_features), dtype,
                                minval=-bound, maxval=bound)
    bias = jax.random.uniform(kb, (out_features,), dtype,
                              minval=-bound, maxval=bound)
    return weight, bias


if __name__ == "__main__":
    # Small shapes implied by the forward: (batch, seq, in_features)
    batch, seq, in_features, out_features = 2, 8, 32, 64

    key = jax.random.PRNGKey(0)
    kx, kp = jax.random.split(key)
    x = jax.random.normal(kx, (batch, seq, in_features), dtype=jnp.float32)
    weight, bias = init_params(kp, in_features, out_features)

    ref = x @ weight.T + bias

    # Default path: PyTorch (N, K) weight layout, bias fused in the epilogue.
    out = jax.block_until_ready(
        sparse_method_linear_output_forward(x, weight, bias))
    assert out.shape == (batch, seq, out_features), out.shape
    assert jnp.allclose(out, ref, atol=1e-4, rtol=1e-4), (
        f"max abs err {jnp.max(jnp.abs(out - ref))}")

    # No-bias path.
    out_nb = jax.block_until_ready(
        sparse_method_linear_output_forward(x, weight, None))
    assert jnp.allclose(out_nb, x @ weight.T, atol=1e-4, rtol=1e-4), (
        f"max abs err (no bias) {jnp.max(jnp.abs(out_nb - x @ weight.T))}")

    # Pre-transposed (K, N) weight path (one-time transpose at param load).
    w_kn = prepare_weight(weight)
    out_kn = jax.block_until_ready(
        sparse_method_linear_output_forward(x, w_kn, bias, weight_layout="kn"))
    assert jnp.allclose(out_kn, ref, atol=1e-4, rtol=1e-4), (
        f"max abs err (kn layout) {jnp.max(jnp.abs(out_kn - ref))}")

    # TODO(synk): the module's custom backward (sparse-row Triton matmul) is
    # backward-only and intentionally not implemented here.
    print("KERNEL_OK")
</pallas_src>

<mosaic_0001>
module attributes {stable_mosaic.version = 11 : i64} {
  func.func @_linear_kernel(%arg0: i32, %arg1: i32, %arg2: i32, %arg3: memref<16x32xf32, #tpu.memory_space<vmem>>, %arg4: memref<128x32xf32, #tpu.memory_space<vmem>>, %arg5: memref<1x128xf32, #tpu.memory_space<vmem>>, %arg6: memref<16x128xf32, #tpu.memory_space<vmem>>) attributes {dimension_semantics = [#tpu.dimension_semantics<parallel>, #tpu.dimension_semantics<parallel>, #tpu.dimension_semantics<arbitrary>], iteration_bounds = array<i64: 1, 1, 1>, scalar_prefetch = 0 : i64, scratch_operands = 0 : i64, tpu.core_type = #tpu.core_type<tc>, window_params = [{transform_indices = @transform_0, window_bounds = array<i64: 16, 32>}, {transform_indices = @transform_1, window_bounds = array<i64: 128, 32>}, {transform_indices = @transform_2, window_bounds = array<i64: 1, 128>}, {transform_indices = @transform_3, window_bounds = array<i64: 16, 128>}]} {
    %c0_i32 = arith.constant 0 : i32
    %0 = arith.cmpi eq, %arg2, %c0_i32 : i32
    %1 = arith.extui %0 : i1 to i32
    %c0_i32_0 = arith.constant 0 : i32
    %2 = arith.cmpi ne, %1, %c0_i32_0 : i32
    scf.if %2 {
      %cst_10 = arith.constant 0.000000e+00 : f32
      %12 = vector.broadcast %cst_10 : f32 to vector<16x128xf32>
      %c0_11 = arith.constant 0 : index
      %c0_12 = arith.constant 0 : index
      %13 = vector.load %arg6[%c0_11, %c0_12] : memref<16x128xf32, #tpu.memory_space<vmem>>, vector<16x128xf32>
      tpu.vector_store %arg6[%c0_11, %c0_12], %12 {strides = array<i32>} : memref<16x128xf32, #tpu.memory_space<vmem>>, vector<16x128xf32>,
    } else {
    }
    %c0 = arith.constant 0 : index
    %c0_1 = arith.constant 0 : index
    %3 = vector.load %arg3[%c0, %c0_1] : memref<16x32xf32, #tpu.memory_space<vmem>>, vector<16x32xf32>
    %c0_2 = arith.constant 0 : index
    %c0_3 = arith.constant 0 : index
    %4 = vector.load %arg6[%c0_2, %c0_3] : memref<16x128xf32, #tpu.memory_space<vmem>>, vector<16x128xf32>
    %c0_4 = arith.constant 0 : index
    %c0_5 = arith.constant 0 : index
    %5 = vector.load %arg4[%c0_4, %c0_5] : memref<128x32xf32, #tpu.memory_space<vmem>>, vector<128x32xf32>
    %cst = arith.constant dense<0.000000e+00> : vector<16x128xf32>
    %6 = tpu.matmul %3, %5, %cst {dimension_numbers = #tpu.dot_dimension_numbers<[1], [1], [0], [0], [0, 0, 1, 0], [], []>} : vector<16x32xf32>, vector<128x32xf32>, vector<16x128xf32> -> vector<16x128xf32>
    %7 = arith.addf %4, %6 : vector<16x128xf32>
    %c0_6 = arith.constant 0 : index
    %c0_7 = arith.constant 0 : index
    %8 = vector.load %arg6[%c0_6, %c0_7] : memref<16x128xf32, #tpu.memory_space<vmem>>, vector<16x128xf32>
    tpu.vector_store %arg6[%c0_6, %c0_7], %7 {strides = array<i32>} : memref<16x128xf32, #tpu.memory_space<vmem>>, vector<16x128xf32>,
    %c0_i32_8 = arith.constant 0 : i32
    %9 = arith.cmpi eq, %arg2, %c0_i32_8 : i32
    %10 = arith.extui %9 : i1 to i32
    %c0_i32_9 = arith.constant 0 : i32
    %11 = arith.cmpi ne, %10, %c0_i32_9 : i32
    scf.if %11 {
      %c0_10 = arith.constant 0 : index
      %c0_11 = arith.constant 0 : index
      %12 = vector.load %arg6[%c0_10, %c0_11] : memref<16x128xf32, #tpu.memory_space<vmem>>, vector<16x128xf32>
      %c0_12 = arith.constant 0 : index
      %c0_13 = arith.constant 0 : index
      %13 = vector.load %arg5[%c0_12, %c0_13] : memref<1x128xf32, #tpu.memory_space<vmem>>, vector<1x128xf32>
      %14 = vector.broadcast %13 : vector<1x128xf32> to vector<16x128xf32>
      %15 = arith.addf %12, %14 : vector<16x128xf32>
      %c0_14 = arith.constant 0 : index
      %c0_15 = arith.constant 0 : index
      %16 = vector.load %arg6[%c0_14, %c0_15] : memref<16x128xf32, #tpu.memory_space<vmem>>, vector<16x128xf32>
      tpu.vector_store %arg6[%c0_14, %c0_15], %15 {strides = array<i32>} : memref<16x128xf32, #tpu.memory_space<vmem>>, vector<16x128xf32>,
    } else {
    }
    return
  }
  func.func @transform_0(%arg0: i32, %arg1: i32, %arg2: i32) -> (i32, i32) {
    %c0_i32 = arith.constant 0 : i32
    return %arg0, %arg2 : i32, i32
  }
  func.func @transform_1(%arg0: i32, %arg1: i32, %arg2: i32) -> (i32, i32) {
    %c0_i32 = arith.constant 0 : i32
    return %arg1, %arg2 : i32, i32
  }
  func.func @transform_2(%arg0: i32, %arg1: i32, %arg2: i32) -> (i32, i32) {
    %c0_i32 = arith.constant 0 : i32
    %c0_i32_0 = arith.constant 0 : i32
    return %c0_i32, %arg1 : i32, i32
  }
  func.func @transform_3(%arg0: i32, %arg1: i32, %arg2: i32) -> (i32, i32) {
    %c0_i32 = arith.constant 0 : i32
    return %arg0, %arg1 : i32, i32
  }
}

</mosaic_0001>

<bundles_post_ra>
// kernel: tpu_custom_call.1
= control target key start
LH: loop header
LB: loop body
LE: loop exit
PB: predicated region body
PF: predicated region fallthrough
CT: control target
= control target key end

     0   :  { %vm41_vm0 = vcmask 261120   ;;  %s336_s0 = inlined_call_operand.vmem [shape: f32[16,32], index: 0, kind: input, shape index: {}]   ;;  %s337_s1 = inlined_call_operand.vmem [shape: f32[128,32], index: 1, kind: input, shape index: {}]   ;;  %s338_s2 = inlined_call_operand.vmem [shape: f32[1,128], index: 2, kind: input, shape index: {}]   ;;  %s339_s3 = inlined_call_operand.hbm [shape: f32[16,128], index: 3, kind: output, shape index: {}]  }
   0x1   :  { %v40_v0 = vld [vmem:[%s337_s1 + $0x78] sm:$0xff]  ;;  %v39_v1 = vld [vmem:[%s337_s1 + $0x70] sm:$0xff] }
   0x2   :  { %154 = vmatpush.xpose.msk.msra.mxu0 %vm41_vm0, %v40_v0  ;;  %172 = vmatpush.xpose.msk.msra.mxu1 %vm41_vm0, %v40_v0 }
   0x3   :  { %8 = vsyncpa [#allocation3], 0  ;;  %v38_v2 = vld [vmem:[%s337_s1 + $0x68] sm:$0xff]  ;;  %v37_v3 = vld [vmem:[%s337_s1 + $0x60] sm:$0xff]  ;;  %s142_s26 = sshll.u32 %s339_s3, 4  ;;  %s221_s27 = smov 8   ;;  %s143_s26 = int_to_ptr.hbm [resolvable:$true] %s142_s26 }
   0x4   :  { %v36_v4 = vld [vmem:[%s337_s1 + $0x58] sm:$0xff]  ;;  %v35_v5 = vld [vmem:[%s337_s1 + $0x50] sm:$0xff]  ;;  %v34_v6 = vld [vmem:[%s337_s1 + $0x48] sm:$0xff] }
   0x5   :  { %v33_v7 = vld [vmem:[%s337_s1 + $0x40] sm:$0xff]  ;;  %v32_v8 = vld [vmem:[%s337_s1 + $0x38] sm:$0xff]  ;;  %v31_v9 = vld [vmem:[%s337_s1 + $0x30] sm:$0xff] }
   0x6   :  { %155 = vmatpush.xpose.msk.msra.mxu0 %vm41_vm0, %v39_v1  ;;  %173 = vmatpush.xpose.msk.msra.mxu1 %vm41_vm0, %v39_v1  ;;  %v30_v10 = vld [vmem:[%s337_s1 + $0x28] sm:$0xff]  ;;  %v29_v11 = vld [vmem:[%s337_s1 + $0x20] sm:$0xff]  ;;  %v28_v12 = vld [vmem:[%s337_s1 + $0x18] sm:$0xff] }
   0x7   :  { %v27_v13 = vld [vmem:[%s337_s1 + $0x10] sm:$0xff]  ;;  %v26_v14 = vld [vmem:[%s337_s1 + $0x8] sm:$0xff]  ;;  %v25_v15 = vld [vmem:[%s337_s1] sm:$0xff]  ;;  %s219_s1 = smov [#allocation2]  }
   0x8   :  { %v21_v16 = vld [vmem:[%s336_s0] sm:$0xff]  ;;  %v22_v17 = vld [vmem:[%s336_s0 + $0x8] sm:$0xff]  ;;  %s140_s23 = sshll.u32 %s219_s1, 4  ;;  %s220_s0 = smov 128   ;;  %s141_s23 = int_to_ptr.vmem [resolvable:$true] %s140_s23 }
   0x9   :  { %v192_v18 = vld [vmem:[%s338_s2] ss:$0 sm:$0xff] }
   0xa   :  { %156 = vmatpush.xpose.msk.msra.mxu0 %vm41_vm0, %v38_v2  ;;  %174 = vmatpush.xpose.msk.msra.mxu1 %vm41_vm0, %v38_v2 }
   0xe   :  { %157 = vmatpush.xpose.msk.msra.mxu0 %vm41_vm0, %v37_v3  ;;  %175 = vmatpush.xpose.msk.msra.mxu1 %vm41_vm0, %v37_v3 }
  0x12   :  { %158 = vmatpush.xpose.msk.msra.mxu0 %vm41_vm0, %v36_v4  ;;  %176 = vmatpush.xpose.msk.msra.mxu1 %vm41_vm0, %v36_v4 }
  0x16   :  { %159 = vmatpush.xpose.msk.msra.mxu0 %vm41_vm0, %v35_v5  ;;  %177 = vmatpush.xpose.msk.msra.mxu1 %vm41_vm0, %v35_v5 }
  0x1a   :  { %160 = vmatpush.xpose.msk.msra.mxu0 %vm41_vm0, %v34_v6  ;;  %178 = vmatpush.xpose.msk.msra.mxu1 %vm41_vm0, %v34_v6 }
  0x1e   :  { %161 = vmatpush.xpose.msk.msra.mxu0 %vm41_vm0, %v33_v7  ;;  %179 = vmatpush.xpose.msk.msra.mxu1 %vm41_vm0, %v33_v7 }
  0x22   :  { %162 = vmatpush.xpose.msk.msra.mxu0 %vm41_vm0, %v32_v8  ;;  %180 = vmatpush.xpose.msk.msra.mxu1 %vm41_vm0, %v32_v8 }
  0x26   :  { %163 = vmatpush.xpose.msk.msra.mxu0 %vm41_vm0, %v31_v9  ;;  %181 = vmatpush.xpose.msk.msra.mxu1 %vm41_vm0, %v31_v9 }
  0x2a   :  { %164 = vmatpush.xpose.msk.msra.mxu0 %vm41_vm0, %v30_v10  ;;  %182 = vmatpush.xpose.msk.msra.mxu1 %vm41_vm0, %v30_v10 }
  0x2e   :  { %165 = vmatpush.xpose.msk.msra.mxu0 %vm41_vm0, %v29_v11  ;;  %183 = vmatpush.xpose.msk.msra.mxu1 %vm41_vm0, %v29_v11 }
  0x32   :  { %166 = vmatpush.xpose.msk.msra.mxu0 %vm41_vm0, %v28_v12  ;;  %184 = vmatpush.xpose.msk.msra.mxu1 %vm41_vm0, %v28_v12 }
  0x36   :  { %167 = vmatpush.xpose.msk.msra.mxu0 %vm41_vm0, %v27_v13  ;;  %185 = vmatpush.xpose.msk.msra.mxu1 %vm41_vm0, %v27_v13 }
  0x3a   :  { %168 = vmatpush.xpose.msk.msra.mxu0 %vm41_vm0, %v26_v14  ;;  %186 = vmatpush.xpose.msk.msra.mxu1 %vm41_vm0, %v26_v14 }
  0x3e   :  { %169 = vmatpush.xpose.msk.msra.mxu0 %vm41_vm0, %v25_v15  ;;  %187 = vmatpush.xpose.msk.msra.mxu1 %vm41_vm0, %v25_v15 }
  0x41   :  { %170 = vmatmul.msk.f32.vlgmr.msra.gmra.mxu0 %vm41_vm0, %v21_v16  ;;  %171 = vmatmul.msk.f32.vlgmr.msra.gmra.mxu1 %vm41_vm0, %v22_v17 }
  0xbe   :  { %v113_v19 = vpop.f32.mrf.mxu0  ;;  %v116_v20 = vpop.f32.mrf.mxu1 }
  0xbf   :  { %v132_v21 = vadd.f32 %v192_v18, %v113_v19  ;;  %v133_v22 = vadd.f32 %v192_v18, %v116_v20 }
  0xc1   :  { %134 = vst [vmem:[#allocation2] sm:$0xff] %v132_v21 }
  0xc2   :  { %135 = vst [vmem:[#allocation2 + $0x8] sm:$0xff] %v133_v22 }
  0xc3   :  { %148 = dma.vmem_to_hbm [thread:$0]  %s141_s23, 256, %s143_s26, [#allocation3], %s220_s0, %s220_s0, %s221_s27  }
  0xc4   :  { %217 = dma.done.wait [#allocation3], 256  }
  0xc5   :  { %218 = vsyncadd [#allocation3], 4294967040 }
  0xc6   :  { %153 = vsyncpa [#allocation3], 1 }

</bundles_post_ra>
